<compile_context>
chip_gen: v6e
topology: v6e:2x2x1
jax: 0.10.0
libtpu: 0.0.40
codegen_flags: <defaults>
</compile_context>

<pallas_src>
import jax
import jax.numpy as jnp
from jax import lax
from jax.experimental import pallas as pl
from jax.experimental.pallas import tpu as pltpu


# ---------------- generation-aware VMEM budget ----------------

def _vmem_capacity_bytes():
    try:
        cap = int(pltpu.get_tpu_info().vmem_capacity_bytes)
        if cap > 0:
            return cap
    except Exception:
        pass
    return 64 * 1024 * 1024            # conservative fallback (v7x: 64 MiB per TC)


_VMEM_CAP = _vmem_capacity_bytes()
# scoped limit: ~48 MiB on v7x (64 MiB VMEM), ~96 MiB on v5e/v6e (128 MiB VMEM)
_VMEM_LIMIT = max(min((_VMEM_CAP * 3) // 4, 96 * 1024 * 1024), 32 * 1024 * 1024)
# budget for double-buffered streamed blocks; leaves headroom for compiler scratch
_STREAM_BUDGET = (_VMEM_LIMIT * 3) // 4

_SMEM = pl.BlockSpec(memory_space=pltpu.MemorySpace.SMEM)


def _round_up(x, m):
    return ((x + m - 1) // m) * m


def _cdiv(a, b):
    return (a + b - 1) // b


def _lane_bytes(n, itemsize=4):
    # bytes of one row of a (TB, n) block once padded to 128 lanes in VMEM
    return _round_up(max(n, 1), 128) * itemsize


def _pick_tile(n_rows, row_stream_bytes, resident_bytes, align):
    """Largest align-aligned batch tile whose double-buffered streamed blocks plus the
    resident blocks fit the streaming budget; capped so large batches keep >= ~4 grid
    programs (v7x megacore / pipeline overlap) without dropping below ~512-row tiles."""
    raw = (_STREAM_BUDGET - resident_bytes) // max(1, 2 * row_stream_bytes)
    tb = (raw // align) * align
    if tb <= 0:
        return 0                        # caller picks a fallback
    parallel_cap = max(_round_up(_cdiv(n_rows, 4), align),
                       _round_up(min(512, n_rows), align))
    tb = min(tb, parallel_cap)
    if tb >= n_rows:
        return n_rows                   # single full-extent block
    return tb


def _compiler_params():
    return pltpu.CompilerParams(
        dimension_semantics=("parallel",),   # batch tiles are independent
        vmem_limit_bytes=int(_VMEM_LIMIT),
    )


# ---------------- kernels: O == 1 (VPU matvec, scalar PopArt stats via SMEM) ----------------

def _linear_o1_kernel(bias_ref, feat_ref, w_ref, value_ref):
    # value = feature @ w^T + b, computed as a VPU multiply + lane reduce (no MXU matvec
    # wasting 127/128 MXU columns, no per-step RHS layout fixup).
    w_row = w_ref[...].astype(jnp.float32)                  # (1, D), resident
    s = jnp.sum(feat_ref[...].astype(jnp.float32) * w_row, axis=-1, keepdims=True)
    value_ref[...] = (s + bias_ref[0]).astype(value_ref.dtype)


def _fused_o1_kernel(bias_ref, mean_ref, istd_ref, feat_ref, w_ref, vt_ref,
                     value_ref, vt_out_ref):
    _linear_o1_kernel(bias_ref, feat_ref, w_ref, value_ref)
    x = vt_ref[...].astype(jnp.float32)                     # lane-dense (tbr, 128) tile
    vt_out_ref[...] = ((x - mean_ref[0]) * istd_ref[0]).astype(vt_out_ref.dtype)


def _normalize_o1_kernel(mean_ref, istd_ref, x_ref, out_ref):
    x = x_ref[...].astype(jnp.float32)
    out_ref[...] = ((x - mean_ref[0]) * istd_ref[0]).astype(out_ref.dtype)


# ---------------- kernels: O > 1 (MXU matmul, resident (1, O) rows in VMEM) ----------------

def _linear_oN_kernel(feat_ref, wT_ref, bias_ref, value_ref):
    acc = jnp.dot(feat_ref[...], wT_ref[...], preferred_element_type=jnp.float32)
    value_ref[...] = (acc + bias_ref[...]).astype(value_ref.dtype)


def _fused_oN_kernel(feat_ref, wT_ref, bias_ref, vt_ref, mean_ref, istd_ref,
                     value_ref, vt_out_ref):
    _linear_oN_kernel(feat_ref, wT_ref, bias_ref, value_ref)
    x = vt_ref[...].astype(jnp.float32)
    vt_out_ref[...] = ((x - mean_ref[...]) * istd_ref[...]).astype(vt_out_ref.dtype)


def _normalize_oN_kernel(mean_ref, istd_ref, x_ref, out_ref):
    x = x_ref[...].astype(jnp.float32)
    out_ref[...] = ((x - mean_ref[...]) * istd_ref[...]).astype(out_ref.dtype)


# ---------------- pallas_call wrappers ----------------

def _linear_o1_call(feature, weight, bias):
    B, D = feature.shape
    row_bytes = _lane_bytes(D) + _lane_bytes(1)             # feature in + value out (padded)
    resident = 8 * _lane_bytes(D)                           # weight (1, D)
    tb = _pick_tile(B, row_bytes, resident, 8) or min(8, B)
    return pl.pallas_call(
        _linear_o1_kernel,
        grid=(_cdiv(B, tb),),
        in_specs=[
            _SMEM,                                          # bias (1,)
            pl.BlockSpec((tb, D), lambda i: (i, 0)),        # feature tile
            pl.BlockSpec((1, D), lambda i: (0, 0)),         # weight, resident
        ],
        out_specs=pl.BlockSpec((tb, 1), lambda i: (i, 0)),
        out_shape=jax.ShapeDtypeStruct((B, 1), jnp.float32),
        compiler_params=_compiler_params(),
    )(bias, feature, weight)


def _fused_o1_dense_call(feature, weight, bias, vt2d, mean, istd):
    """O == 1 fused path; vt2d is the (B, 1) target reshaped lane-dense to (B//128, 128)."""
    B, D = feature.shape
    R = vt2d.shape[0]                                       # == B // 128
    row_bytes = _lane_bytes(D) + _lane_bytes(1) + 2 * 4     # feat + value out + vt in/out
    resident = 8 * _lane_bytes(D)
    tb = _pick_tile(B, row_bytes, resident, 1024)           # 1024 -> vt blocks 8-sublane aligned
    if tb == 0:
        return None                                         # huge D: caller falls back
    tbr = R if tb == B else tb // 128
    vt_spec = pl.BlockSpec((tbr, 128), lambda i: (i, 0))
    value, vt_out = pl.pallas_call(
        _fused_o1_kernel,
        grid=(_cdiv(B, tb),),
        in_specs=[
            _SMEM, _SMEM, _SMEM,                            # bias, mean, inv_std (scalars)
            pl.BlockSpec((tb, D), lambda i: (i, 0)),        # feature tile
            pl.BlockSpec((1, D), lambda i: (0, 0)),         # weight, resident
            vt_spec,                                        # lane-dense v_target tile
        ],
        out_specs=(pl.BlockSpec((tb, 1), lambda i: (i, 0)), vt_spec),
        out_shape=(jax.ShapeDtypeStruct((B, 1), jnp.float32),
                   jax.ShapeDtypeStruct((R, 128), jnp.float32)),
        compiler_params=_compiler_params(),
    )(bias, mean, istd, feature, weight, vt2d)
    return value, vt_out


def _normalize_o1_call(x, mean, istd):
    """Normalize an arbitrarily-shaped target with scalar PopArt stats (O == 1),
    presented lane-dense as (rows, 128) blocks (pads the flattened tail if needed)."""
    shape = x.shape
    flat = x.reshape(-1).astype(jnp.float32)
    n = flat.shape[0]
    n_pad = _round_up(n, 128)
    if n_pad != n:
        flat = jnp.pad(flat, (0, n_pad - n))
    rows = n_pad // 128
    x2 = flat.reshape(rows, 128)
    tb = _pick_tile(rows, 2 * 128 * 4, 0, 8) or min(8, rows)
    out = pl.pallas_call(
        _normalize_o1_kernel,
        grid=(_cdiv(rows, tb),),
        in_specs=[_SMEM, _SMEM, pl.BlockSpec((tb, 128), lambda i: (i, 0))],
        out_specs=pl.BlockSpec((tb, 128), lambda i: (i, 0)),
        out_shape=jax.ShapeDtypeStruct((rows, 128), jnp.float32),
        compiler_params=_compiler_params(),
    )(mean, istd, x2)
    out = out.reshape(-1)
    if n_pad != n:
        out = out[:n]
    return out.reshape(shape)


def _oN_row_bytes(D, O, n_streamed_o_blocks):
    return _lane_bytes(D) + n_streamed_o_blocks * _lane_bytes(O)


def _oN_resident_bytes(D, O, n_rows_1xo):
    return (_round_up(D, 8) * _round_up(O, 128) + n_rows_1xo * 8 * _round_up(O, 128)) * 4


def _linear_oN_call(feature, wT, bias_row):
    B, D = feature.shape
    O = wT.shape[1]
    tb = _pick_tile(B, _oN_row_bytes(D, O, 1), _oN_resident_bytes(D, O, 1), 8) or min(8, B)
    return pl.pallas_call(
        _linear_oN_kernel,
        grid=(_cdiv(B, tb),),
        in_specs=[
            pl.BlockSpec((tb, D), lambda i: (i, 0)),        # feature tile
            pl.BlockSpec((D, O), lambda i: (0, 0)),         # weight^T, resident
            pl.BlockSpec((1, O), lambda i: (0, 0)),         # bias row, resident
        ],
        out_specs=pl.BlockSpec((tb, O), lambda i: (i, 0)),
        out_shape=jax.ShapeDtypeStruct((B, O), jnp.float32),
        compiler_params=_compiler_params(),
    )(feature, wT, bias_row)


def _fused_oN_call(feature, wT, bias_row, vt, mean_row, istd_row):
    B, D = feature.shape
    O = wT.shape[1]
    tb = _pick_tile(B, _oN_row_bytes(D, O, 3), _oN_resident_bytes(D, O, 3), 8) or min(8, B)
    bo_spec = pl.BlockSpec((tb, O), lambda i: (i, 0))
    row_spec = pl.BlockSpec((1, O), lambda i: (0, 0))
    return pl.pallas_call(
        _fused_oN_kernel,
        grid=(_cdiv(B, tb),),
        in_specs=[
            pl.BlockSpec((tb, D), lambda i: (i, 0)),        # feature tile
            pl.BlockSpec((D, O), lambda i: (0, 0)),         # weight^T, resident
            row_spec,                                       # bias
            bo_spec,                                        # unnormalized v_target tile
            row_spec,                                       # debiased mean
            row_spec,                                       # 1 / std
        ],
        out_specs=(bo_spec, bo_spec),
        out_shape=(jax.ShapeDtypeStruct((B, O), jnp.float32),
                   jax.ShapeDtypeStruct((B, O), jnp.float32)),
        compiler_params=_compiler_params(),
    )(feature, wT, bias_row, vt, mean_row, istd_row)


def _normalize_oN_call(x2d, mean_row, istd_row):
    R, O = x2d.shape
    tb = _pick_tile(R, 2 * _lane_bytes(O), 2 * 8 * _lane_bytes(O), 8) or min(8, R)
    return pl.pallas_call(
        _normalize_oN_kernel,
        grid=(_cdiv(R, tb),),
        in_specs=[
            pl.BlockSpec((1, O), lambda i: (0, 0)),
            pl.BlockSpec((1, O), lambda i: (0, 0)),
            pl.BlockSpec((tb, O), lambda i: (i, 0)),
        ],
        out_specs=pl.BlockSpec((tb, O), lambda i: (i, 0)),
        out_shape=jax.ShapeDtypeStruct((R, O), jnp.float32),
        compiler_params=_compiler_params(),
    )(mean_row, istd_row, x2d)


# ---------------- forward (matches ValueHead.forward semantics) ----------------

def _debiased_mean_var(mean, mean_sq, debiasing_term, epsilon):
    d = jnp.maximum(debiasing_term, epsilon)
    dm = mean / d
    dvar = jnp.maximum(mean_sq / d - dm * dm, 0.01)
    return dm, dvar


def value_head_forward(params, feature, unnormalized_v_target=None,
                       use_popart=True, epsilon=1e-5):
    """value = feature @ W^T + b; v_target = PopArt-normalized target (or passthrough).

    Everything stays f32: casting the feature to bf16 in the wrapper would add a full
    extra HBM read+write of the feature, a net loss on this memory-bound op.
    """
    weight = params["weight"].astype(jnp.float32)           # (O, D)
    bias = params["bias"].astype(jnp.float32)                # (O,)
    B, _ = feature.shape
    O = weight.shape[0]
    feature = feature.astype(jnp.float32)

    def linear_only():
        if O == 1:
            return _linear_o1_call(feature, weight, bias)
        return _linear_oN_call(feature, jnp.transpose(weight), bias.reshape(1, O))

    vt = unnormalized_v_target
    if vt is None or not use_popart:
        return linear_only(), vt

    assert vt.shape[-1] == O, "trailing dim of v_target must equal output_dim"
    # TODO(synk): ValueHead.update() (EMA running stats with dist.all_reduce and in-place
    # weight/bias rescaling) is a distributed, stateful op outside this forward pass;
    # the PopArt stats are consumed as-is here.
    dm, dvar = _debiased_mean_var(params["mean"], params["mean_sq"],
                                  params["debiasing_term"], epsilon)
    istd = lax.rsqrt(dvar)

    if O == 1:
        if vt.ndim == 2 and vt.shape == (B, 1) and B % 128 == 0:
            vt2d = vt.reshape(B // 128, 128).astype(jnp.float32)   # free, lane-dense view
            res = _fused_o1_dense_call(feature, weight, bias, vt2d, dm, istd)
            if res is not None:
                value, vt_dense = res
                return value, vt_dense.reshape(vt.shape)
        # fallback: VPU matvec + lane-dense normalize of the flattened target
        return _linear_o1_call(feature, weight, bias), _normalize_o1_call(vt, dm, istd)

    wT = jnp.transpose(weight)                               # tiny one-time (D, O) transpose
    bias_row = bias.reshape(1, O)
    mean_row = dm.reshape(1, O).astype(jnp.float32)
    istd_row = istd.reshape(1, O).astype(jnp.float32)
    if vt.ndim == 2 and vt.shape == (B, O):
        return _fused_oN_call(feature, wT, bias_row, vt.astype(jnp.float32),
                              mean_row, istd_row)
    value = _linear_oN_call(feature, wT, bias_row)
    v_target = _normalize_oN_call(vt.reshape(-1, O).astype(jnp.float32),
                                  mean_row, istd_row).reshape(vt.shape)
    return value, v_target


# ---------------- deterministic parameter init & reference ----------------

def init_value_head_params(key, input_dim, output_dim):
    # reset_parameters(): xavier_uniform weight, zero bias, zero PopArt stats.
    bound = (6.0 / (input_dim + output_dim)) ** 0.5
    weight = jax.random.uniform(key, (output_dim, input_dim), jnp.float32, -bound, bound)
    return {
        "weight": weight,
        "bias": jnp.zeros((output_dim,), jnp.float32),
        "mean": jnp.zeros((output_dim,), jnp.float32),
        "mean_sq": jnp.zeros((output_dim,), jnp.float32),
        "debiasing_term": jnp.zeros((1,), jnp.float32),
    }


def _reference(params, feature, vt, epsilon=1e-5):
    value = jnp.dot(feature, params["weight"].T,
                    precision=jax.lax.Precision.HIGHEST) + params["bias"]
    if vt is None:
        return value, None
    dm, dvar = _debiased_mean_var(params["mean"], params["mean_sq"],
                                  params["debiasing_term"], epsilon)
    return value, (vt - dm) / jnp.sqrt(dvar)


# ---------------- main ----------------

if __name__ == "__main__":
    keys = jax.random.split(jax.random.PRNGKey(0), 8)

    # Case 1: output_dim = 1, batch multiple of 128 -> single fused launch, lane-dense target.
    B1, D1 = 256, 32
    p1 = init_value_head_params(keys[0], D1, 1)
    f1 = jax.random.normal(keys[1], (B1, D1), jnp.float32)
    t1 = jax.random.normal(keys[2], (B1, 1), jnp.float32)
    v1, vt1 = value_head_forward(p1, f1, t1, use_popart=True)
    jax.block_until_ready((v1, vt1))
    rv1, rt1 = _reference(p1, f1, t1)
    assert v1.shape == (B1, 1) and vt1.shape == (B1, 1)
    assert jnp.allclose(v1, rv1, atol=1e-4, rtol=1e-4)
    assert jnp.allclose(vt1, rt1, atol=1e-5, rtol=1e-5)

    # Case 2: output_dim = 1, odd batch + 3-D target -> matvec + padded lane-dense normalize.
    B2 = 40
    f2 = jax.random.normal(keys[3], (B2, D1), jnp.float32)
    t2 = jax.random.normal(keys[4], (5, B2, 1), jnp.float32)
    v2, vt2 = value_head_forward(p1, f2, t2, use_popart=True)
    jax.block_until_ready((v2, vt2))
    rv2, rt2 = _reference(p1, f2, t2)
    assert vt2.shape == t2.shape
    assert jnp.allclose(v2, rv2, atol=1e-4, rtol=1e-4)
    assert jnp.allclose(vt2, rt2, atol=1e-5, rtol=1e-5)

    # Case 3: output_dim > 1 (MXU path) with non-trivial PopArt stats -> fused launch.
    B3, D3, O3 = 64, 32, 4
    p3 = init_value_head_params(keys[5], D3, O3)
    p3 = dict(p3)
    p3["mean"] = jnp.array([0.05, -0.10, 0.15, 0.025], jnp.float32)
    p3["mean_sq"] = jnp.array([0.75, 0.40, 1.00, 0.55], jnp.float32)
    p3["debiasing_term"] = jnp.array([0.5], jnp.float32)
    f3 = jax.random.normal(keys[6], (B3, D3), jnp.float32)
    t3 = jax.random.normal(keys[7], (B3, O3), jnp.float32)
    v3, vt3 = value_head_forward(p3, f3, t3, use_popart=True)
    jax.block_until_ready((v3, vt3))
    rv3, rt3 = _reference(p3, f3, t3)
    assert jnp.allclose(v3, rv3, atol=2e-2, rtol=2e-2)      # MXU default precision
    assert jnp.allclose(vt3, rt3, atol=1e-5, rtol=1e-5)

    # Case 4: no target -> value only; Case 5: popart disabled -> target passthrough.
    v4, none_t = value_head_forward(p1, f1, None)
    jax.block_until_ready(v4)
    assert none_t is None and jnp.allclose(v4, rv1, atol=1e-4, rtol=1e-4)
    v5, vt5 = value_head_forward(p1, f1, t1, use_popart=False)
    jax.block_until_ready(v5)
    assert vt5 is t1 and jnp.allclose(v5, rv1, atol=1e-4, rtol=1e-4)

    print("KERNEL_OK")
</pallas_src>

<mosaic_0001>
module attributes {stable_mosaic.version = 11 : i64} {
  func.func @_fused_o1_kernel(%arg0: i32, %arg1: memref<1xf32, #tpu.memory_space<smem>>, %arg2: memref<1xf32, #tpu.memory_space<smem>>, %arg3: memref<1xf32, #tpu.memory_space<smem>>, %arg4: memref<256x32xf32, #tpu.memory_space<vmem>>, %arg5: memref<1x32xf32, #tpu.memory_space<vmem>>, %arg6: memref<2x128xf32, #tpu.memory_space<vmem>>, %arg7: memref<256x1xf32, #tpu.memory_space<vmem>>, %arg8: memref<2x128xf32, #tpu.memory_space<vmem>>) attributes {dimension_semantics = [#tpu.dimension_semantics<parallel>], iteration_bounds = array<i64: 1>, scalar_prefetch = 0 : i64, scratch_operands = 0 : i64, tpu.core_type = #tpu.core_type<tc>, window_params = [{transform_indices = @transform_0, window_bounds = array<i64: 1>}, {transform_indices = @transform_1, window_bounds = array<i64: 1>}, {transform_indices = @transform_2, window_bounds = array<i64: 1>}, {transform_indices = @transform_3, window_bounds = array<i64: 256, 32>}, {pipeline_mode = #tpu.pipeline_mode<synchronous>, transform_indices = @transform_4, window_bounds = array<i64: 1, 32>}, {transform_indices = @transform_5, window_bounds = array<i64: 2, 128>}, {transform_indices = @transform_6, window_bounds = array<i64: 256, 1>}, {transform_indices = @transform_7, window_bounds = array<i64: 2, 128>}]} {
    %c0 = arith.constant 0 : index
    %c0_0 = arith.constant 0 : index
    %0 = vector.load %arg5[%c0, %c0_0] : memref<1x32xf32, #tpu.memory_space<vmem>>, vector<1x32xf32>
    %c0_1 = arith.constant 0 : index
    %c0_2 = arith.constant 0 : index
    %1 = vector.load %arg4[%c0_1, %c0_2] : memref<256x32xf32, #tpu.memory_space<vmem>>, vector<256x32xf32>
    %2 = vector.broadcast %0 : vector<1x32xf32> to vector<256x32xf32>
    %3 = arith.mulf %1, %2 : vector<256x32xf32>
    %cst = arith.constant dense<0.000000e+00> : vector<256xf32>
    %4 = vector.multi_reduction <add>, %3, %cst [1] : vector<256x32xf32> to vector<256xf32>
    %5 = vector.shape_cast %4 : vector<256xf32> to vector<256x1xf32>
    %c0_3 = arith.constant 0 : index
    %6 = memref.load %arg1[%c0_3] : memref<1xf32, #tpu.memory_space<smem>>
    %7 = vector.broadcast %6 : f32 to vector<256x1xf32>
    %8 = arith.addf %5, %7 : vector<256x1xf32>
    %c0_4 = arith.constant 0 : index
    %c0_5 = arith.constant 0 : index
    %9 = vector.load %arg7[%c0_4, %c0_5] : memref<256x1xf32, #tpu.memory_space<vmem>>, vector<256x1xf32>
    tpu.vector_store %arg7[%c0_4, %c0_5], %8 {strides = array<i32>} : memref<256x1xf32, #tpu.memory_space<vmem>>, vector<256x1xf32>,
    %c0_6 = arith.constant 0 : index
    %c0_7 = arith.constant 0 : index
    %10 = vector.load %arg6[%c0_6, %c0_7] : memref<2x128xf32, #tpu.memory_space<vmem>>, vector<2x128xf32>
    %c0_8 = arith.constant 0 : index
    %11 = memref.load %arg2[%c0_8] : memref<1xf32, #tpu.memory_space<smem>>
    %12 = vector.broadcast %11 : f32 to vector<2x128xf32>
    %13 = arith.subf %10, %12 : vector<2x128xf32>
    %c0_9 = arith.constant 0 : index
    %14 = memref.load %arg3[%c0_9] : memref<1xf32, #tpu.memory_space<smem>>
    %15 = vector.broadcast %14 : f32 to vector<2x128xf32>
    %16 = arith.mulf %13, %15 : vector<2x128xf32>
    %c0_10 = arith.constant 0 : index
    %c0_11 = arith.constant 0 : index
    %17 = vector.load %arg8[%c0_10, %c0_11] : memref<2x128xf32, #tpu.memory_space<vmem>>, vector<2x128xf32>
    tpu.vector_store %arg8[%c0_10, %c0_11], %16 {strides = array<i32>} : memref<2x128xf32, #tpu.memory_space<vmem>>, vector<2x128xf32>,
    return
  }
  func.func @transform_0(%arg0: i32) -> i32 {
    %c0_i32 = arith.constant 0 : i32
    %c0_i32_0 = arith.constant 0 : i32
    return %c0_i32 : i32
  }
  func.func @transform_1(%arg0: i32) -> i32 {
    %c0_i32 = arith.constant 0 : i32
    %c0_i32_0 = arith.constant 0 : i32
    return %c0_i32 : i32
  }
  func.func @transform_2(%arg0: i32) -> i32 {
    %c0_i32 = arith.constant 0 : i32
    %c0_i32_0 = arith.constant 0 : i32
    return %c0_i32 : i32
  }
  func.func @transform_3(%arg0: i32) -> (i32, i32) {
    %c0_i32 = arith.constant 0 : i32
    %c0_i32_0 = arith.constant 0 : i32
    return %arg0, %c0_i32 : i32, i32
  }
  func.func @transform_4(%arg0: i32) -> (i32, i32) {
    %c0_i32 = arith.constant 0 : i32
    %c0_i32_0 = arith.constant 0 : i32
    %c0_i32_1 = arith.constant 0 : i32
    return %c0_i32, %c0_i32_0 : i32, i32
  }
  func.func @transform_5(%arg0: i32) -> (i32, i32) {
    %c0_i32 = arith.constant 0 : i32
    %c0_i32_0 = arith.constant 0 : i32
    return %arg0, %c0_i32 : i32, i32
  }
  func.func @transform_6(%arg0: i32) -> (i32, i32) {
    %c0_i32 = arith.constant 0 : i32
    %c0_i32_0 = arith.constant 0 : i32
    return %arg0, %c0_i32 : i32, i32
  }
  func.func @transform_7(%arg0: i32) -> (i32, i32) {
    %c0_i32 = arith.constant 0 : i32
    %c0_i32_0 = arith.constant 0 : i32
    return %arg0, %c0_i32 : i32, i32
  }
}

</mosaic_0001>

<bundles_post_ra>
// kernel: tpu_custom_call.1
= control target key start
LH: loop header
LB: loop body
LE: loop exit
PB: predicated region body
PF: predicated region fallthrough
CT: control target
= control target key end

     0   :  { %vm100_vm0 = vcmask 261120   ;;  %s697_s0 = inlined_call_operand.<no memory space> [shape: f32[1], index: 0, kind: input, shape index: {}]   ;;  %s698_s1 = inlined_call_operand.<no memory space> [shape: f32[1], index: 1, kind: input, shape index: {}]   ;;  %s699_s2 = inlined_call_operand.<no memory space> [shape: f32[1], index: 2, kind: input, shape index: {}]   ;;  %s700_s3 = inlined_call_operand.vmem [shape: f32[256,32], index: 3, kind: input, shape index: {}]   ;;  %s701_s4 = inlined_call_operand.vmem [shape: f32[1,32], index: 4, kind: input, shape index: {}]   ;;  %s702_s5 = inlined_call_operand.vmem [shape: f32[2,128], index: 5, kind: input, shape index: {}]   ;;  %s703_s6 = inlined_call_operand.vmem [shape: f32[256,1], index: 6, kind: output, shape index: {0}]   ;;  %s704_s7 = inlined_call_operand.hbm [shape: f32[2,128], index: 7, kind: output, shape index: {1}]  }
   0x1   :  { %v358_v0 = vld [vmem:[%s701_s4] ss:$0 sm:$0xff]  ;;  %v32_v1 = vld [vmem:[%s700_s3 + $0x10] sm:$0xff]  ;;  %v33_v5 = vld [vmem:[%s700_s3 + $0x18] sm:$0xff] }
   0x2   :  { %v30_v2 = vld [vmem:[%s700_s3] sm:$0xff]  ;;  %v70_v3 = vmul.f32 %v358_v0, %v32_v1  ;;  %v31_v6 = vld [vmem:[%s700_s3 + $0x8] sm:$0xff]  ;;  %v71_v7 = vmul.f32 %v358_v0, %v33_v5  ;;  %v37_v17 = vld [vmem:[%s700_s3 + $0x38] sm:$0xff] }
   0x3   :  { %v68_v4 = vmul.f32 %v358_v0, %v30_v2  ;;  %v69_v8 = vmul.f32 %v358_v0, %v31_v6  ;;  %v35_v9 = vld [vmem:[%s700_s3 + $0x28] sm:$0xff]  ;;  %v34_v10 = vld [vmem:[%s700_s3 + $0x20] sm:$0xff]  ;;  %v36_v18 = vld [vmem:[%s700_s3 + $0x30] sm:$0xff]  ;;  %v75_v21 = vmul.f32 %v358_v0, %v37_v17 }
   0x4   :  { %v107_v11 = vsel %vm100_vm0, %v70_v3, 0.0  ;;  %v110_v13 = vsel %vm100_vm0, %v71_v7, 0.0  ;;  %v73_v15 = vmul.f32 %v358_v0, %v35_v9  ;;  %v72_v16 = vmul.f32 %v358_v0, %v34_v10  ;;  %v39_v23 = vld [vmem:[%s700_s3 + $0x48] sm:$0xff]  ;;  %v38_v24 = vld [vmem:[%s700_s3 + $0x40] sm:$0xff] }
   0x5   :  { %v101_v12 = vsel %vm100_vm0, %v68_v4, 0.0  ;;  %108 = vadd.xlane.f32.xlu1 %v107_v11  ;;  %v104_v14 = vsel %vm100_vm0, %v69_v8, 0.0  ;;  %v74_v22 = vmul.f32 %v358_v0, %v36_v18 }
   0x6   :  { %102 = vadd.xlane.f32.xlu0 %v101_v12  ;;  %v116_v19 = vsel %vm100_vm0, %v73_v15, 0.0  ;;  %v113_v20 = vsel %vm100_vm0, %v72_v16, 0.0 }
   0x9   :  { %111 = vadd.xlane.f32.xlu1 %v110_v13 }
   0xa   :  { %105 = vadd.xlane.f32.xlu0 %v104_v14 }
   0xb   :  { %16 = vsyncpa [#allocation6], 0  ;;  %v122_v25 = vsel %vm100_vm0, %v75_v21, 0.0  ;;  %v119_v26 = vsel %vm100_vm0, %v74_v22, 0.0  ;;  %v77_v27 = vmul.f32 %v358_v0, %v39_v23  ;;  %v76_v28 = vmul.f32 %v358_v0, %v38_v24  ;;  %v41_v29 = vld [vmem:[%s700_s3 + $0x58] sm:$0xff]  ;;  %v40_v30 = vld [vmem:[%s700_s3 + $0x50] sm:$0xff] }
   0xc   :  { %v79_v33 = vmul.f32 %v358_v0, %v41_v29  ;;  %v78_v34 = vmul.f32 %v358_v0, %v40_v30  ;;  %v43_v35 = vld [vmem:[%s700_s3 + $0x68] sm:$0xff]  ;;  %v42_v36 = vld [vmem:[%s700_s3 + $0x60] sm:$0xff]  ;;  %v45_v41 = vld [vmem:[%s700_s3 + $0x78] sm:$0xff]  ;;  %s314_s23 = smov [#allocation5]  }
   0xd   :  { %117 = vadd.xlane.f32.xlu1 %v116_v19  ;;  %v128_v31 = vsel %vm100_vm0, %v77_v27, 0.0  ;;  %v125_v32 = vsel %vm100_vm0, %v76_v28, 0.0  ;;  %v81_v39 = vmul.f32 %v358_v0, %v43_v35  ;;  %v80_v40 = vmul.f32 %v358_v0, %v42_v36  ;;  %v44_v42 = vld [vmem:[%s700_s3 + $0x70] sm:$0xff]  ;;  %v47_v47 = vld [vmem:[%s700_s3 + $0x88] sm:$0xff]  ;;  %v46_v48 = vld [vmem:[%s700_s3 + $0x80] sm:$0xff]  ;;  %s280_s24 = sshll.u32 %s314_s23, 4  ;;  %s281_s24 = int_to_ptr.vmem [resolvable:$true] %s280_s24 }
   0xe   :  { %114 = vadd.xlane.f32.xlu0 %v113_v20  ;;  %v134_v37 = vsel %vm100_vm0, %v79_v33, 0.0  ;;  %v131_v38 = vsel %vm100_vm0, %v78_v34, 0.0  ;;  %v83_v45 = vmul.f32 %v358_v0, %v45_v41  ;;  %v82_v46 = vmul.f32 %v358_v0, %v44_v42  ;;  %v49_v53 = vld [vmem:[%s700_s3 + $0x98] sm:$0xff]  ;;  %v48_v54 = vld [vmem:[%s700_s3 + $0x90] sm:$0xff]  ;;  %v51_v59 = vld [vmem:[%s700_s3 + $0xa8] sm:$0xff]  ;;  %s292_s25 = scalar_lea.vmem %s281_s24, 32  ;;  %p297_p1 = scmp.lt.s32.totalorder %s281_s24, %s281_s24 }
   0xf   :  { %v140_v43 = vsel %vm100_vm0, %v81_v39, 0.0  ;;  %v137_v44 = vsel %vm100_vm0, %v80_v40, 0.0  ;;  %v85_v51 = vmul.f32 %v358_v0, %v47_v47  ;;  %v84_v52 = vmul.f32 %v358_v0, %v46_v48  ;;  %v50_v60 = vld [vmem:[%s700_s3 + $0xa0] sm:$0xff]  ;;  %v53_v2 = vld [vmem:[%s700_s3 + $0xb8] sm:$0xff]  ;;  %v52_v3 = vld [vmem:[%s700_s3 + $0xb0] sm:$0xff]  ;;  %p293_p0 = scmp.ne.s32.totalorder %s281_s24, %s292_s25  ;;  %p298_p2 = scmp.lt.s32.totalorder %s292_s25, %s292_s25 }
  0x10   :  { %v146_v49 = vsel %vm100_vm0, %v83_v45, 0.0  ;;  %v143_v50 = vsel %vm100_vm0, %v82_v46, 0.0  ;;  %v87_v57 = vmul.f32 %v358_v0, %v49_v53  ;;  %v86_v58 = vmul.f32 %v358_v0, %v48_v54  ;;  %v55_v8 = vld [vmem:[%s700_s3 + $0xc8] sm:$0xff]  ;;  %v54_v9 = vld [vmem:[%s700_s3 + $0xc0] sm:$0xff]  ;;  %v57_v14 = vld [vmem:[%s700_s3 + $0xd8] sm:$0xff] }
  0x11   :  { %123 = vadd.xlane.f32.xlu1 %v122_v25  ;;  %v152_v55 = vsel %vm100_vm0, %v85_v51, 0.0  ;;  %v149_v56 = vsel %vm100_vm0, %v84_v52, 0.0  ;;  %v89_v63 = vmul.f32 %v358_v0, %v51_v59  ;;  %v88_v1 = vmul.f32 %v358_v0, %v50_v60  ;;  %v56_v15 = vld [vmem:[%s700_s3 + $0xd0] sm:$0xff]  ;;  %v59_v20 = vld [vmem:[%s700_s3 + $0xe8] sm:$0xff]  ;;  %v58_v21 = vld [vmem:[%s700_s3 + $0xe0] sm:$0xff]  ;;  %p299_p3 = por %p298_p2, %p297_p1 }
  0x12   :  { %120 = vadd.xlane.f32.xlu0 %v119_v26  ;;  %v158_v61 = vsel %vm100_vm0, %v87_v57, 0.0  ;;  %v155_v62 = vsel %vm100_vm0, %v86_v58, 0.0  ;;  %v91_v6 = vmul.f32 %v358_v0, %v53_v2  ;;  %v90_v7 = vmul.f32 %v358_v0, %v52_v3  ;;  %v61_v26 = vld [vmem:[%s700_s3 + $0xf8] sm:$0xff]  ;;  %v60_v27 = vld [vmem:[%s700_s3 + $0xf0] sm:$0xff]  ;;  %v264_v34 = vld [vmem:[%s702_s5] sm:$0x3] }
  0x13   :  { %v164_v4 = vsel %vm100_vm0, %v89_v63, 0.0  ;;  %v161_v5 = vsel %vm100_vm0, %v88_v1, 0.0  ;;  %v93_v12 = vmul.f32 %v358_v0, %v55_v8  ;;  %v92_v13 = vmul.f32 %v358_v0, %v54_v9  ;;  %p300_p4 = pnand %p299_p3, %p293_p0 }
  0x14   :  { %v170_v10 = vsel %vm100_vm0, %v91_v6, 0.0  ;;  %v167_v11 = vsel %vm100_vm0, %v90_v7, 0.0  ;;  %v95_v18 = vmul.f32 %v358_v0, %v57_v14  ;;  %v94_v19 = vmul.f32 %v358_v0, %v56_v15 }
  0x15   :  { %129 = vadd.xlane.f32.xlu1 %v128_v31  ;;  %v176_v16 = vsel %vm100_vm0, %v93_v12, 0.0  ;;  %v173_v17 = vsel %vm100_vm0, %v92_v13, 0.0  ;;  %v97_v24 = vmul.f32 %v358_v0, %v59_v20  ;;  %v96_v25 = vmul.f32 %v358_v0, %v58_v21 }
  0x16   :  { %126 = vadd.xlane.f32.xlu0 %v125_v32  ;;  %v182_v22 = vsel %vm100_vm0, %v95_v18, 0.0  ;;  %v179_v23 = vsel %vm100_vm0, %v94_v19, 0.0  ;;  %v99_v30 = vmul.f32 %v358_v0, %v61_v26  ;;  %v98_v31 = vmul.f32 %v358_v0, %v60_v27 }
  0x17   :  { %v188_v28 = vsel %vm100_vm0, %v97_v24, 0.0  ;;  %v185_v29 = vsel %vm100_vm0, %v96_v25, 0.0  ;;  %v266_v35 = vstv %s698_s1  ;;  %v269_v0 = vstv %s699_s2 }
  0x18   :  { %v194_v32 = vsel %vm100_vm0, %v99_v30, 0.0  ;;  %v191_v33 = vsel %vm100_vm0, %v98_v31, 0.0  ;;  %v267_v36 = vsub.f32 %v264_v34, %v266_v35 }
  0x19   :  { %135 = vadd.xlane.f32.xlu1 %v134_v37 }
  0x1a   :  { %132 = vadd.xlane.f32.xlu0 %v131_v38  ;;  %v270_v37 = vmul.f32 %v269_v0, %v267_v36 }
  0x1c   :  { %271 = vst [vmem:[#allocation5] sm:$0x3] %v270_v37 }
  0x1d   :  { %141 = vadd.xlane.f32.xlu1 %v140_v43 }
  0x1e   :  { %138 = vadd.xlane.f32.xlu0 %v137_v44 }
  0x21   :  { %147 = vadd.xlane.f32.xlu1 %v146_v49 }
  0x22   :  { %144 = vadd.xlane.f32.xlu0 %v143_v50 }
  0x25   :  { %153 = vadd.xlane.f32.xlu1 %v152_v55 }
  0x26   :  { %150 = vadd.xlane.f32.xlu0 %v149_v56 }
  0x29   :  { %159 = vadd.xlane.f32.xlu1 %v158_v61 }
  0x2a   :  { %156 = vadd.xlane.f32.xlu0 %v155_v62 }
  0x2d   :  { %165 = vadd.xlane.f32.xlu1 %v164_v4 }
  0x2e   :  { %162 = vadd.xlane.f32.xlu0 %v161_v5 }
  0x31   :  { %171 = vadd.xlane.f32.xlu1 %v170_v10 }
  0x32   :  { %168 = vadd.xlane.f32.xlu0 %v167_v11 }
  0x35   :  { %177 = vadd.xlane.f32.xlu1 %v176_v16 }
  0x36   :  { %174 = vadd.xlane.f32.xlu0 %v173_v17 }
  0x39   :  { %183 = vadd.xlane.f32.xlu1 %v182_v22 }
  0x3a   :  { %180 = vadd.xlane.f32.xlu0 %v179_v23 }
  0x3d   :  { %189 = vadd.xlane.f32.xlu1 %v188_v28 }
  0x3e   :  { %186 = vadd.xlane.f32.xlu0 %v185_v29 }
  0x41   :  { %195 = vadd.xlane.f32.xlu1 %v194_v32 }
  0x42   :  { %192 = vadd.xlane.f32.xlu0 %v191_v33 }
  0x43   :  { %303 = shalt.err (!%p300_p4)
}
  0x44   :  { %283 = dma.vmem_to_hbm [thread:$0]  %s281_s24, 32, %s704_s7, [#allocation6]   ;;  %v535_v38 = vstv %s697_s0  ;;  %vm231_vm1 = vcmask 7168  }
  0x8e   :  { %v109_v39 = vpop.xlane.xlu1 %108 }
  0x8f   :  { %v103_v40 = vpop.xlane.xlu0 %102  ;;  %v201_v41 = vadd.f32 %v535_v38, %v109_v39 }
  0x90   :  { %v199_v42 = vadd.f32 %v535_v38, %v103_v40 }
  0x91   :  { %234 = vst.msk [vmem:[%s703_s6 + $0x10] sm:$0xff] %vm231_vm1, %v201_v41 }
  0x92   :  { %232 = vst.msk [vmem:[%s703_s6] sm:$0xff] %vm231_vm1, %v199_v42  ;;  %v112_v43 = vpop.xlane.xlu1 %111 }
  0x93   :  { %v106_v44 = vpop.xlane.xlu0 %105  ;;  %v202_v45 = vadd.f32 %v535_v38, %v112_v43 }
  0x94   :  { %v200_v46 = vadd.f32 %v535_v38, %v106_v44 }
  0x95   :  { %235 = vst.msk [vmem:[%s703_s6 + $0x18] sm:$0xff] %vm231_vm1, %v202_v45 }
  0x96   :  { %233 = vst.msk [vmem:[%s703_s6 + $0x8] sm:$0xff] %vm231_vm1, %v200_v46  ;;  %v118_v47 = vpop.xlane.xlu1 %117 }
  0x97   :  { %v115_v48 = vpop.xlane.xlu0 %114  ;;  %v204_v49 = vadd.f32 %v535_v38, %v118_v47 }
  0x98   :  { %v203_v50 = vadd.f32 %v535_v38, %v115_v48 }
  0x99   :  { %237 = vst.msk [vmem:[%s703_s6 + $0x28] sm:$0xff] %vm231_vm1, %v204_v49 }
  0x9a   :  { %236 = vst.msk [vmem:[%s703_s6 + $0x20] sm:$0xff] %vm231_vm1, %v203_v50  ;;  %v124_v51 = vpop.xlane.xlu1 %123 }
  0x9b   :  { %v121_v52 = vpop.xlane.xlu0 %120  ;;  %v206_v53 = vadd.f32 %v535_v38, %v124_v51 }
  0x9c   :  { %v205_v54 = vadd.f32 %v535_v38, %v121_v52 }
  0x9d   :  { %239 = vst.msk [vmem:[%s703_s6 + $0x38] sm:$0xff] %vm231_vm1, %v206_v53 }
  0x9e   :  { %238 = vst.msk [vmem:[%s703_s6 + $0x30] sm:$0xff] %vm231_vm1, %v205_v54  ;;  %v130_v55 = vpop.xlane.xlu1 %129 }
  0x9f   :  { %v127_v56 = vpop.xlane.xlu0 %126  ;;  %v208_v57 = vadd.f32 %v535_v38, %v130_v55 }
  0xa0   :  { %v207_v58 = vadd.f32 %v535_v38, %v127_v56 }
  0xa1   :  { %241 = vst.msk [vmem:[%s703_s6 + $0x48] sm:$0xff] %vm231_vm1, %v208_v57 }
  0xa2   :  { %240 = vst.msk [vmem:[%s703_s6 + $0x40] sm:$0xff] %vm231_vm1, %v207_v58  ;;  %v136_v59 = vpop.xlane.xlu1 %135 }
  0xa3   :  { %v133_v60 = vpop.xlane.xlu0 %132  ;;  %v210_v61 = vadd.f32 %v535_v38, %v136_v59 }
  0xa4   :  { %v209_v62 = vadd.f32 %v535_v38, %v133_v60 }
  0xa5   :  { %243 = vst.msk [vmem:[%s703_s6 + $0x58] sm:$0xff] %vm231_vm1, %v210_v61 }
  0xa6   :  { %242 = vst.msk [vmem:[%s703_s6 + $0x50] sm:$0xff] %vm231_vm1, %v209_v62  ;;  %v142_v63 = vpop.xlane.xlu1 %141 }
  0xa7   :  { %v139_v1 = vpop.xlane.xlu0 %138  ;;  %v212_v2 = vadd.f32 %v535_v38, %v142_v63 }
  0xa8   :  { %v211_v3 = vadd.f32 %v535_v38, %v139_v1 }
  0xa9   :  { %245 = vst.msk [vmem:[%s703_s6 + $0x68] sm:$0xff] %vm231_vm1, %v212_v2 }
  0xaa   :  { %244 = vst.msk [vmem:[%s703_s6 + $0x60] sm:$0xff] %vm231_vm1, %v211_v3  ;;  %v148_v4 = vpop.xlane.xlu1 %147 }
  0xab   :  { %v145_v5 = vpop.xlane.xlu0 %144  ;;  %v214_v6 = vadd.f32 %v535_v38, %v148_v4 }
  0xac   :  { %v213_v7 = vadd.f32 %v535_v38, %v145_v5 }
  0xad   :  { %247 = vst.msk [vmem:[%s703_s6 + $0x78] sm:$0xff] %vm231_vm1, %v214_v6 }
  0xae   :  { %246 = vst.msk [vmem:[%s703_s6 + $0x70] sm:$0xff] %vm231_vm1, %v213_v7  ;;  %v154_v8 = vpop.xlane.xlu1 %153 }
  0xaf   :  { %v151_v9 = vpop.xlane.xlu0 %150  ;;  %v216_v10 = vadd.f32 %v535_v38, %v154_v8 }
  0xb0   :  { %v215_v11 = vadd.f32 %v535_v38, %v151_v9 }
  0xb1   :  { %249 = vst.msk [vmem:[%s703_s6 + $0x88] sm:$0xff] %vm231_vm1, %v216_v10 }
  0xb2   :  { %248 = vst.msk [vmem:[%s703_s6 + $0x80] sm:$0xff] %vm231_vm1, %v215_v11  ;;  %v160_v12 = vpop.xlane.xlu1 %159 }
  0xb3   :  { %v157_v13 = vpop.xlane.xlu0 %156  ;;  %v218_v14 = vadd.f32 %v535_v38, %v160_v12 }
  0xb4   :  { %v217_v15 = vadd.f32 %v535_v38, %v157_v13 }
  0xb5   :  { %251 = vst.msk [vmem:[%s703_s6 + $0x98] sm:$0xff] %vm231_vm1, %v218_v14 }
  0xb6   :  { %250 = vst.msk [vmem:[%s703_s6 + $0x90] sm:$0xff] %vm231_vm1, %v217_v15  ;;  %v166_v16 = vpop.xlane.xlu1 %165 }
  0xb7   :  { %v163_v17 = vpop.xlane.xlu0 %162  ;;  %v220_v18 = vadd.f32 %v535_v38, %v166_v16 }
  0xb8   :  { %v219_v19 = vadd.f32 %v535_v38, %v163_v17 }
  0xb9   :  { %253 = vst.msk [vmem:[%s703_s6 + $0xa8] sm:$0xff] %vm231_vm1, %v220_v18 }
  0xba   :  { %252 = vst.msk [vmem:[%s703_s6 + $0xa0] sm:$0xff] %vm231_vm1, %v219_v19  ;;  %v172_v20 = vpop.xlane.xlu1 %171 }
  0xbb   :  { %v169_v21 = vpop.xlane.xlu0 %168  ;;  %v222_v22 = vadd.f32 %v535_v38, %v172_v20 }
  0xbc   :  { %v221_v23 = vadd.f32 %v535_v38, %v169_v21 }
  0xbd   :  { %255 = vst.msk [vmem:[%s703_s6 + $0xb8] sm:$0xff] %vm231_vm1, %v222_v22 }
  0xbe   :  { %254 = vst.msk [vmem:[%s703_s6 + $0xb0] sm:$0xff] %vm231_vm1, %v221_v23  ;;  %v178_v24 = vpop.xlane.xlu1 %177 }
  0xbf   :  { %v175_v25 = vpop.xlane.xlu0 %174  ;;  %v224_v26 = vadd.f32 %v535_v38, %v178_v24 }
  0xc0   :  { %v223_v27 = vadd.f32 %v535_v38, %v175_v25 }
  0xc1   :  { %257 = vst.msk [vmem:[%s703_s6 + $0xc8] sm:$0xff] %vm231_vm1, %v224_v26 }
  0xc2   :  { %256 = vst.msk [vmem:[%s703_s6 + $0xc0] sm:$0xff] %vm231_vm1, %v223_v27  ;;  %v184_v28 = vpop.xlane.xlu1 %183 }
  0xc3   :  { %v181_v29 = vpop.xlane.xlu0 %180  ;;  %v226_v30 = vadd.f32 %v535_v38, %v184_v28 }
  0xc4   :  { %v225_v31 = vadd.f32 %v535_v38, %v181_v29 }
  0xc5   :  { %259 = vst.msk [vmem:[%s703_s6 + $0xd8] sm:$0xff] %vm231_vm1, %v226_v30 }
  0xc6   :  { %258 = vst.msk [vmem:[%s703_s6 + $0xd0] sm:$0xff] %vm231_vm1, %v225_v31  ;;  %v190_v32 = vpop.xlane.xlu1 %189 }
  0xc7   :  { %v187_v33 = vpop.xlane.xlu0 %186  ;;  %v228_v34 = vadd.f32 %v535_v38, %v190_v32 }
  0xc8   :  { %v227_v35 = vadd.f32 %v535_v38, %v187_v33 }
  0xc9   :  { %261 = vst.msk [vmem:[%s703_s6 + $0xe8] sm:$0xff] %vm231_vm1, %v228_v34 }
  0xca   :  { %260 = vst.msk [vmem:[%s703_s6 + $0xe0] sm:$0xff] %vm231_vm1, %v227_v35  ;;  %v196_v36 = vpop.xlane.xlu1 %195 }
  0xcb   :  { %v193_v0 = vpop.xlane.xlu0 %192  ;;  %v230_v37 = vadd.f32 %v535_v38, %v196_v36 }
  0xcc   :  { %v229_v39 = vadd.f32 %v535_v38, %v193_v0 }
  0xcd   :  { %263 = vst.msk [vmem:[%s703_s6 + $0xf8] sm:$0xff] %vm231_vm1, %v230_v37 }
  0xce   :  { %262 = vst.msk [vmem:[%s703_s6 + $0xf0] sm:$0xff] %vm231_vm1, %v229_v39 }
  0xcf   :  { %312 = dma.done.wait [#allocation6], 32  }
  0xd0   :  { %313 = vsyncadd [#allocation6], 4294967264 }
  0xd1   :  { %289 = vsyncpa [#allocation6], 1 }

</bundles_post_ra>
